<compile_context>
chip_gen: v7x
topology: tpu7x:2x2x1
jax: 0.10.0
libtpu: 0.0.40
codegen_flags: <defaults>
</compile_context>

<pallas_src>
import math

import jax
import jax.numpy as jnp
from jax.experimental import pallas as pl
from jax.experimental.pallas import tpu as pltpu


# ----------------------------- fused Pallas kernel ------------------------------

def fused_forward_kernel(patches_ref,   # (1, 9*Cin, HW)   per-batch im2col patches
                         convw_ref,     # (Cconv, 9*Cin)
                         convb_ref,     # (Cconv, 1)
                         wqkf_ref,      # (3*S, Cconv)     stacked [q|k|feat] projection
                         bqkf_ref,      # (3*S, 1)
                         whead_ref,     # (C, S)           folded v*wo*fc*layer_out
                         bhead_ref,     # (C, 1)
                         o_ref):        # (1, C, 1)
    s = wqkf_ref.shape[0] // 3          # h_dim (= attention sequence length, d_k == 1)
    hw = patches_ref.shape[2]

    # --- conv3x3(pad=1) as a lane-dense GEMM + ReLU:  (Cconv, HW), HW on lanes ---
    y = jnp.dot(convw_ref[...], patches_ref[0],
                preferred_element_type=jnp.float32) + convb_ref[...]
    y = jnp.maximum(y, 0.0)                                       # (Cconv, HW)

    # --- global average pool: lane (spatial) reduction on the XLU -> (Cconv, 1) ---
    pooled = jnp.sum(y, axis=1, keepdims=True) * (1.0 / hw)

    # --- stacked q / k / feat projection, one tiny column matmul -> (3S, 1) ---
    qkf = jnp.dot(wqkf_ref[...], pooled,
                  preferred_element_type=jnp.float32) + bqkf_ref[...]
    q = qkf[0:s, :]            # (S, 1)  = wq*feat + bq
    k = qkf[s:2 * s, :]        # (S, 1)  = wk*feat + bk
    f = qkf[2 * s:, :]         # (S, 1)  = feat (V/mha_linear folded downstream)

    # --- attention: scores[i,j] = q[i]*k[j]  (d_k == 1, so no 1/sqrt(d) scale) ---
    k_row = jnp.transpose(k)                                      # (1, S)
    scores = q * k_row                                            # (S, S) outer product
    mx = jnp.max(scores, axis=-1, keepdims=True)
    e = jnp.exp(scores - mx)
    denom = jnp.sum(e, axis=-1, keepdims=True)
    attn = e * pl.reciprocal(denom, approx=True)                  # softmax (EUP recip)

    # attn @ feat on the MXU; V, mha_linear, fc and layer_out are folded into w/b_head.
    af = jnp.dot(attn, f, preferred_element_type=jnp.float32)     # (S, 1)
    out = jnp.dot(whead_ref[...], af,
                  preferred_element_type=jnp.float32) + bhead_ref[...]   # (C, 1)
    o_ref[0] = out


# --------------------------------- JAX glue --------------------------------------

def im2col_3x3_same(x_nchw):
    """3x3, stride 1, padding 1 im2col. Returns (B, 9*C_in, H*W), row order (ki, kj, c)."""
    B, C, H, W = x_nchw.shape
    xp = jnp.pad(x_nchw, ((0, 0), (0, 0), (1, 1), (1, 1)))
    cols = []
    for ki in range(3):
        for kj in range(3):
            cols.append(xp[:, :, ki:ki + H, kj:kj + W])           # (B, C, H, W)
    pat = jnp.concatenate(cols, axis=1)                           # (B, 9*C, H, W)
    return pat.reshape(B, 9 * C, H * W)


def init_params(key, c_in=4, c_conv=8, h_dim=32, n_classes=2):
    """PyTorch-style init, then fold everything foldable into kernel-layout weights."""
    ks = jax.random.split(key, 16)

    def unif(k, shape, fan_in):
        bound = 1.0 / math.sqrt(fan_in)
        return jax.random.uniform(k, shape, jnp.float32, -bound, bound)

    # ---- raw parameters in PyTorch layout ----
    conv_w = unif(ks[0], (c_conv, c_in, 3, 3), c_in * 9)          # (Cout, Cin, kh, kw)
    conv_b = unif(ks[1], (c_conv,), c_in * 9)
    proj_w = unif(ks[2], (h_dim, c_conv), c_conv)                 # Linear(Cconv, h_dim)
    proj_b = unif(ks[3], (h_dim,), c_conv)
    wq, bq, wk, bk, wv, bv, wo, bo = [unif(ks[4 + i], (), 1) for i in range(8)]
    fc_w = unif(ks[12], (1000, h_dim), h_dim)                     # Linear(h_dim, 1000)
    fc_b = unif(ks[13], (1000,), h_dim)
    out_w = unif(ks[14], (n_classes, 1000), 1000)                 # Linear(1000, C)
    out_b = unif(ks[15], (n_classes,), 1000)

    p = {}
    # conv as (Cconv, 9*Cin) GEMM matrix, column order (ki, kj, c_in) matching im2col.
    p['conv_w'] = jnp.transpose(conv_w, (0, 2, 3, 1)).reshape(c_conv, 9 * c_in)
    p['conv_b'] = conv_b.reshape(c_conv, 1)

    # Stacked [q | k | feat] projection (columns), with wq,bq,wk,bk folded in:
    #   q = wq*(proj_w @ pooled + proj_b) + bq, etc.
    pb = proj_b.reshape(h_dim, 1)
    p['w_qkf'] = jnp.concatenate([wq * proj_w, wk * proj_w, proj_w], axis=0)   # (3S, Cconv)
    p['b_qkf'] = jnp.concatenate([wq * pb + bq, wk * pb + bk, pb], axis=0)     # (3S, 1)

    # Fold V, mha_linear, fc and layer_out into one (C, S) head:
    #   mha_out = wo*wv*(attn@feat) + (wo*bv + bo)   (rows of attn sum to 1)
    #   logits  = mha_out @ fc_w^T @ out_w^T + fc_b @ out_w^T + out_b
    alpha = wo * wv
    beta = wo * bv + bo
    w_comb = out_w @ fc_w                                          # (C, S)
    p['w_head'] = alpha * w_comb                                   # (C, S)
    p['b_head'] = (beta * jnp.sum(w_comb, axis=1, keepdims=True)
                   + (out_w @ fc_b).reshape(n_classes, 1)
                   + out_b.reshape(n_classes, 1))                  # (C, 1)
    return p


def stand_atten_img_forward(x, p):
    B, _, H, W = x.shape
    HW = H * W
    c_conv, nine_c = p['conv_w'].shape
    n_classes, h_dim = p['w_head'].shape

    patches = im2col_3x3_same(x)                                   # (B, 9*Cin, HW)

    out = pl.pallas_call(
        fused_forward_kernel,
        out_shape=jax.ShapeDtypeStruct((B, n_classes, 1), jnp.float32),
        grid=(B,),
        in_specs=[
            pl.BlockSpec((1, nine_c, HW), lambda b: (b, 0, 0)),        # per-batch patches
            pl.BlockSpec((c_conv, nine_c), lambda b: (0, 0)),          # conv weight
            pl.BlockSpec((c_conv, 1), lambda b: (0, 0)),               # conv bias
            pl.BlockSpec((3 * h_dim, c_conv), lambda b: (0, 0)),       # stacked q/k/feat
            pl.BlockSpec((3 * h_dim, 1), lambda b: (0, 0)),
            pl.BlockSpec((n_classes, h_dim), lambda b: (0, 0)),        # folded head
            pl.BlockSpec((n_classes, 1), lambda b: (0, 0)),
        ],
        out_specs=pl.BlockSpec((1, n_classes, 1), lambda b: (b, 0, 0)),
        compiler_params=pltpu.CompilerParams(
            dimension_semantics=("parallel",),          # batch grid -> both TCs on v7x
            vmem_limit_bytes=32 * 1024 * 1024,
        ),
    )(patches, p['conv_w'], p['conv_b'], p['w_qkf'], p['b_qkf'],
      p['w_head'], p['b_head'])
    return out.reshape(B, n_classes)


if __name__ == "__main__":
    key = jax.random.PRNGKey(0)
    pkey, xkey = jax.random.split(key)
    B, C_in, H, W = 2, 4, 16, 16
    C_conv, h_dim, n_classes = 8, 32, 2

    params = init_params(pkey, c_in=C_in, c_conv=C_conv, h_dim=h_dim, n_classes=n_classes)
    x = jax.random.normal(xkey, (B, C_in, H, W), jnp.float32)      # NCHW input

    y = jax.jit(stand_atten_img_forward)(x, params)
    jax.block_until_ready(y)
    assert y.shape == (B, n_classes) and y.dtype == jnp.float32
    print("KERNEL_OK")
</pallas_src>

<mosaic_0001>
module attributes {stable_mosaic.version = 11 : i64} {
  func.func @fused_forward_kernel(%arg0: i32, %arg1: memref<1x36x256xf32, #tpu.memory_space<vmem>>, %arg2: memref<8x36xf32, #tpu.memory_space<vmem>>, %arg3: memref<8x1xf32, #tpu.memory_space<vmem>>, %arg4: memref<96x8xf32, #tpu.memory_space<vmem>>, %arg5: memref<96x1xf32, #tpu.memory_space<vmem>>, %arg6: memref<2x32xf32, #tpu.memory_space<vmem>>, %arg7: memref<2x1xf32, #tpu.memory_space<vmem>>, %arg8: memref<1x2x1xf32, #tpu.memory_space<vmem>>) attributes {dimension_semantics = [#tpu.dimension_semantics<parallel>], iteration_bounds = array<i64: 2>, scalar_prefetch = 0 : i64, scratch_operands = 0 : i64, tpu.core_type = #tpu.core_type<tc>, window_params = [{transform_indices = @transform_0, window_bounds = array<i64: 1, 36, 256>}, {pipeline_mode = #tpu.pipeline_mode<synchronous>, transform_indices = @transform_1, window_bounds = array<i64: 8, 36>}, {pipeline_mode = #tpu.pipeline_mode<synchronous>, transform_indices = @transform_2, window_bounds = array<i64: 8, 1>}, {pipeline_mode = #tpu.pipeline_mode<synchronous>, transform_indices = @transform_3, window_bounds = array<i64: 96, 8>}, {pipeline_mode = #tpu.pipeline_mode<synchronous>, transform_indices = @transform_4, window_bounds = array<i64: 96, 1>}, {pipeline_mode = #tpu.pipeline_mode<synchronous>, transform_indices = @transform_5, window_bounds = array<i64: 2, 32>}, {pipeline_mode = #tpu.pipeline_mode<synchronous>, transform_indices = @transform_6, window_bounds = array<i64: 2, 1>}, {transform_indices = @transform_7, window_bounds = array<i64: 1, 2, 1>}]} {
    %c0 = arith.constant 0 : index
    %c0_0 = arith.constant 0 : index
    %0 = vector.load %arg2[%c0, %c0_0] : memref<8x36xf32, #tpu.memory_space<vmem>>, vector<8x36xf32>
    %c0_1 = arith.constant 0 : index
    %c0_2 = arith.constant 0 : index
    %c0_3 = arith.constant 0 : index
    %1 = vector.load %arg1[%c0_1, %c0_2, %c0_3] : memref<1x36x256xf32, #tpu.memory_space<vmem>>, vector<1x36x256xf32>
    %2 = vector.shape_cast %1 : vector<1x36x256xf32> to vector<36x256xf32>
    %cst = arith.constant dense<0.000000e+00> : vector<8x256xf32>
    %3 = tpu.matmul %0, %2, %cst {dimension_numbers = #tpu.dot_dimension_numbers<[1], [0], [0], [1], [0, 0, 1, 1], [], []>} : vector<8x36xf32>, vector<36x256xf32>, vector<8x256xf32> -> vector<8x256xf32>
    %c0_4 = arith.constant 0 : index
    %c0_5 = arith.constant 0 : index
    %4 = vector.load %arg3[%c0_4, %c0_5] : memref<8x1xf32, #tpu.memory_space<vmem>>, vector<8x1xf32>
    %5 = vector.broadcast %4 : vector<8x1xf32> to vector<8x256xf32>
    %6 = arith.addf %3, %5 : vector<8x256xf32>
    %cst_6 = arith.constant 0.000000e+00 : f32
    %7 = vector.broadcast %cst_6 : f32 to vector<8x256xf32>
    %8 = arith.maximumf %6, %7 : vector<8x256xf32>
    %cst_7 = arith.constant dense<0.000000e+00> : vector<8xf32>
    %9 = vector.multi_reduction <add>, %8, %cst_7 [1] : vector<8x256xf32> to vector<8xf32>
    %10 = vector.shape_cast %9 : vector<8xf32> to vector<8x1xf32>
    %cst_8 = arith.constant 3.906250e-03 : f32
    %11 = vector.broadcast %cst_8 : f32 to vector<8x1xf32>
    %12 = arith.mulf %10, %11 : vector<8x1xf32>
    %c0_9 = arith.constant 0 : index
    %c0_10 = arith.constant 0 : index
    %13 = vector.load %arg4[%c0_9, %c0_10] : memref<96x8xf32, #tpu.memory_space<vmem>>, vector<96x8xf32>
    %cst_11 = arith.constant dense<0.000000e+00> : vector<96x1xf32>
    %14 = tpu.matmul %13, %12, %cst_11 {dimension_numbers = #tpu.dot_dimension_numbers<[1], [0], [0], [1], [0, 0, 1, 1], [], []>} : vector<96x8xf32>, vector<8x1xf32>, vector<96x1xf32> -> vector<96x1xf32>
    %c0_12 = arith.constant 0 : index
    %c0_13 = arith.constant 0 : index
    %15 = vector.load %arg5[%c0_12, %c0_13] : memref<96x1xf32, #tpu.memory_space<vmem>>, vector<96x1xf32>
    %16 = arith.addf %14, %15 : vector<96x1xf32>
    %17 = vector.extract_strided_slice %16 {offsets = [0, 0], sizes = [32, 1], strides = [1, 1]} : vector<96x1xf32> to vector<32x1xf32>
    %18 = vector.extract_strided_slice %16 {offsets = [32, 0], sizes = [32, 1], strides = [1, 1]} : vector<96x1xf32> to vector<32x1xf32>
    %19 = vector.extract_strided_slice %16 {offsets = [64, 0], sizes = [32, 1], strides = [1, 1]} : vector<96x1xf32> to vector<32x1xf32>
    %20 = tpu.transpose %18, [1, 0] : vector<32x1xf32> -> vector<1x32xf32>
    %21 = vector.broadcast %17 : vector<32x1xf32> to vector<32x32xf32>
    %22 = vector.broadcast %20 : vector<1x32xf32> to vector<32x32xf32>
    %23 = arith.mulf %21, %22 : vector<32x32xf32>
    %cst_14 = arith.constant dense<0xFF800000> : vector<32xf32>
    %24 = vector.multi_reduction <maximumf>, %23, %cst_14 [1] : vector<32x32xf32> to vector<32xf32>
    %25 = vector.shape_cast %24 : vector<32xf32> to vector<32x1xf32>
    %26 = vector.broadcast %25 : vector<32x1xf32> to vector<32x32xf32>
    %27 = arith.subf %23, %26 : vector<32x32xf32>
    %28 = math.exp %27 : vector<32x32xf32>
    %cst_15 = arith.constant dense<0.000000e+00> : vector<32xf32>
    %29 = vector.multi_reduction <add>, %28, %cst_15 [1] : vector<32x32xf32> to vector<32xf32>
    %30 = vector.shape_cast %29 : vector<32xf32> to vector<32x1xf32>
    %31 = tpu.reciprocal %30 {approx = true} : vector<32x1xf32> -> vector<32x1xf32>
    %32 = vector.broadcast %31 : vector<32x1xf32> to vector<32x32xf32>
    %33 = arith.mulf %28, %32 : vector<32x32xf32>
    %cst_16 = arith.constant dense<0.000000e+00> : vector<32x1xf32>
    %34 = tpu.matmul %33, %19, %cst_16 {dimension_numbers = #tpu.dot_dimension_numbers<[1], [0], [0], [1], [0, 0, 1, 1], [], []>} : vector<32x32xf32>, vector<32x1xf32>, vector<32x1xf32> -> vector<32x1xf32>
    %c0_17 = arith.constant 0 : index
    %c0_18 = arith.constant 0 : index
    %35 = vector.load %arg6[%c0_17, %c0_18] : memref<2x32xf32, #tpu.memory_space<vmem>>, vector<2x32xf32>
    %cst_19 = arith.constant dense<0.000000e+00> : vector<2x1xf32>
    %36 = tpu.matmul %35, %34, %cst_19 {dimension_numbers = #tpu.dot_dimension_numbers<[1], [0], [0], [1], [0, 0, 1, 1], [], []>} : vector<2x32xf32>, vector<32x1xf32>, vector<2x1xf32> -> vector<2x1xf32>
    %c0_20 = arith.constant 0 : index
    %c0_21 = arith.constant 0 : index
    %37 = vector.load %arg7[%c0_20, %c0_21] : memref<2x1xf32, #tpu.memory_space<vmem>>, vector<2x1xf32>
    %38 = arith.addf %36, %37 : vector<2x1xf32>
    %c0_22 = arith.constant 0 : index
    %c0_23 = arith.constant 0 : index
    %c0_24 = arith.constant 0 : index
    %39 = vector.load %arg8[%c0_22, %c0_23, %c0_24] : memref<1x2x1xf32, #tpu.memory_space<vmem>>, vector<1x2x1xf32>
    %40 = vector.shape_cast %39 : vector<1x2x1xf32> to vector<2x1xf32>
    %41 = vector.shape_cast %38 : vector<2x1xf32> to vector<1x2x1xf32>
    tpu.vector_store %arg8[%c0_22, %c0_23, %c0_24], %41 {strides = array<i32>} : memref<1x2x1xf32, #tpu.memory_space<vmem>>, vector<1x2x1xf32>,
    return
  }
  func.func @transform_0(%arg0: i32) -> (i32, i32, i32) {
    %c0_i32 = arith.constant 0 : i32
    %c0_i32_0 = arith.constant 0 : i32
    %c0_i32_1 = arith.constant 0 : i32
    return %arg0, %c0_i32, %c0_i32_0 : i32, i32, i32
  }
  func.func @transform_1(%arg0: i32) -> (i32, i32) {
    %c0_i32 = arith.constant 0 : i32
    %c0_i32_0 = arith.constant 0 : i32
    %c0_i32_1 = arith.constant 0 : i32
    return %c0_i32, %c0_i32_0 : i32, i32
  }
  func.func @transform_2(%arg0: i32) -> (i32, i32) {
    %c0_i32 = arith.constant 0 : i32
    %c0_i32_0 = arith.constant 0 : i32
    %c0_i32_1 = arith.constant 0 : i32
    return %c0_i32, %c0_i32_0 : i32, i32
  }
  func.func @transform_3(%arg0: i32) -> (i32, i32) {
    %c0_i32 = arith.constant 0 : i32
    %c0_i32_0 = arith.constant 0 : i32
    %c0_i32_1 = arith.constant 0 : i32
    return %c0_i32, %c0_i32_0 : i32, i32
  }
  func.func @transform_4(%arg0: i32) -> (i32, i32) {
    %c0_i32 = arith.constant 0 : i32
    %c0_i32_0 = arith.constant 0 : i32
    %c0_i32_1 = arith.constant 0 : i32
    return %c0_i32, %c0_i32_0 : i32, i32
  }
  func.func @transform_5(%arg0: i32) -> (i32, i32) {
    %c0_i32 = arith.constant 0 : i32
    %c0_i32_0 = arith.constant 0 : i32
    %c0_i32_1 = arith.constant 0 : i32
    return %c0_i32, %c0_i32_0 : i32, i32
  }
  func.func @transform_6(%arg0: i32) -> (i32, i32) {
    %c0_i32 = arith.constant 0 : i32
    %c0_i32_0 = arith.constant 0 : i32
    %c0_i32_1 = arith.constant 0 : i32
    return %c0_i32, %c0_i32_0 : i32, i32
  }
  func.func @transform_7(%arg0: i32) -> (i32, i32, i32) {
    %c0_i32 = arith.constant 0 : i32
    %c0_i32_0 = arith.constant 0 : i32
    %c0_i32_1 = arith.constant 0 : i32
    return %arg0, %c0_i32, %c0_i32_0 : i32, i32, i32
  }
}

</mosaic_0001>

<bundles_post_ra>
// kernel: stand_atten_img_forward.1
= control target key start
LH: loop header
LB: loop body
LE: loop exit
PB: predicated region body
PF: predicated region fallthrough
CT: control target
= control target key end

     0   :  { %s1105_s24 = smov 0   ;;  %s1237_s0 = inlined_call_operand.vmem [shape: f32[2,36,256], index: 0, kind: input, shape index: {}]   ;;  %s1238_s1 = inlined_call_operand.vmem [shape: f32[8,36], index: 1, kind: input, shape index: {}]   ;;  %s1239_s2 = inlined_call_operand.vmem [shape: f32[8,1], index: 2, kind: input, shape index: {}]   ;;  %s1240_s3 = inlined_call_operand.vmem [shape: f32[96,8], index: 3, kind: input, shape index: {}]   ;;  %s1241_s4 = inlined_call_operand.vmem [shape: f32[96,1], index: 4, kind: input, shape index: {}]   ;;  %s1242_s5 = inlined_call_operand.vmem [shape: f32[2,32], index: 5, kind: input, shape index: {}]   ;;  %s1243_s6 = inlined_call_operand.vmem [shape: f32[2,1], index: 6, kind: input, shape index: {}]   ;;  %s1244_s7 = inlined_call_operand.vmem [shape: f32[2,2,1], index: 7, kind: output, shape index: {}]  }
   0x1 LB: > { %s900_s25 = sadd.s32 4294967295, %s1059_s24   ;;  %p904_p0 = scmp.ge.s32.totalorder %s1059_s24, 1  ;;  %s1059_s24 = sphi %s1105_s24, %s17_s24  }
   0x2   : > { %p237_p1 = scmp.lt.s32.totalorder %s1059_s24, 3 }
   0x4   : > { %p238_p2 = pnand %p904_p0, %p237_p1 }
   0x5   : > { %p268_p3 = scmp.lt.s32.totalorder (!%p238_p2), %s900_s25, 1  ;;  %v1061_v0 = vmov (!%p238_p2), 0.0   ;;  %v1062_v1 = vmov (!%p238_p2), 0   ;;  %v288_v2 = vld [vmem:[%s1239_s2] sm:$0xff] (!%p238_p2)  ;;  %vm298_vm0 = vcmask (!%p238_p2), 1043456   ;;  %vm294_vm1 = vcmask (!%p238_p2), 293888  }
   0x6   : > { %241 = sbr.rel (%p238_p2) target bundleno = 1554 (0x612), region = 48  ;;  %369 = vmatprep.mubr.f32.mxu0 (!%p238_p2), %v1061_v0  ;;  %1035 = vset.pattern.permute.xlu0 (!%p238_p2), %v1062_v1  ;;  %v277_v17 = vld [vmem:[%s1238_s1] sm:$0xff] (!%p238_p2)  ;;  %vm406_vm2 = vcmask (!%p238_p2), 64512   ;;  %v383_v29 = vld [vmem:[%s1240_s3 + $0x8] sm:$0xff] (!%p238_p2)  ;;  %v384_v30 = vld [vmem:[%s1240_s3 + $0x10] sm:$0xff] (!%p238_p2)  ;;  %vm628_vm3 = vcmask (!%p238_p2), 261120  }
   0x7   : > { %291 = vperm.xlu0 (!%p238_p2), %1035, %v288_v2   ;;  %1036 = vset.pattern.permute.xlu1 (!%p238_p2), %v1062_v1  ;;  %v382_v26 = vld [vmem:[%s1240_s3] sm:$0xff] (!%p238_p2)  ;;  %v385_v31 = vld [vmem:[%s1240_s3 + $0x18] sm:$0xff] (!%p238_p2)  ;;  %v387_v33 = vld [vmem:[%s1240_s3 + $0x28] sm:$0xff] (!%p238_p2)  ;;  %vm1064_vm4 = vmmov (!%p238_p2), 0   ;;  %vm845_vm5 = vcmask (!%p238_p2), 1024  }
   0x8   : > { %957 = vmatprep.mubr.msk.f32.mxu1 (!%p238_p2), %vm406_vm2, %v382_v26  ;;  %v386_v32 = vld [vmem:[%s1240_s3 + $0x20] sm:$0xff] (!%p238_p2)  ;;  %v388_v34 = vld [vmem:[%s1240_s3 + $0x30] sm:$0xff] (!%p238_p2)  ;;  %v389_v35 = vld [vmem:[%s1240_s3 + $0x38] sm:$0xff] (!%p238_p2) }
   0x9   : > { %v395_v36 = vld [vmem:[%s1241_s4 + $0x8] sm:$0xff] (!%p238_p2)  ;;  %v394_v40 = vld [vmem:[%s1241_s4] sm:$0xff] (!%p238_p2)  ;;  %v397_v41 = vld [vmem:[%s1241_s4 + $0x18] sm:$0xff] (!%p238_p2) }
   0xa   : > { %v396_v48 = vld [vmem:[%s1241_s4 + $0x10] sm:$0xff] (!%p238_p2)  ;;  %v398_v52 = vld [vmem:[%s1241_s4 + $0x20] sm:$0xff] (!%p238_p2)  ;;  %v399_v54 = vld [vmem:[%s1241_s4 + $0x28] sm:$0xff] (!%p238_p2) }
   0xb   : > { %v400_v55 = vld [vmem:[%s1241_s4 + $0x30] sm:$0xff] (!%p238_p2)  ;;  %v401_v58 = vld [vmem:[%s1241_s4 + $0x38] sm:$0xff] (!%p238_p2)  ;;  %v390_v60 = vld [vmem:[%s1240_s3 + $0x40] sm:$0xff] (!%p238_p2) }
   0xc   : > { %v391_v61 = vld [vmem:[%s1240_s3 + $0x48] sm:$0xff] (!%p238_p2)  ;;  %v392_v62 = vld [vmem:[%s1240_s3 + $0x50] sm:$0xff] (!%p238_p2)  ;;  %v393_v63 = vld [vmem:[%s1240_s3 + $0x58] sm:$0xff] (!%p238_p2) }
   0xd   : > { %s1246_s25 = smov (!%p268_p3, %s900_s25), 1 }
   0xe   : > { %s1022_s28 = smul.u32 80, %s1246_s25  ;;  %s906_s19 = sshll.u32 %s1246_s25, 1 }
   0xf   : > { %s276_s26 = scalar_lea.vmem %s1244_s7, %s906_s19 }
  0x10   : > { %s272_s8 = scalar_lea.vmem %s1237_s0, %s1022_s28 }
  0x11   : > { %v279_v3 = vld [vmem:[%s272_s8 + $0x8] sm:$0xff]  ;;  %v281_v4 = vld [vmem:[%s272_s8 + $0x18] sm:$0xff]  ;;  %v278_v5 = vld [vmem:[%s272_s8] sm:$0xff] }
  0x12   : > { %v1000_v6 = vpack.c.bf16 %v281_v4, %v279_v3  ;;  %v280_v7 = vld [vmem:[%s272_s8 + $0x10] sm:$0xff]  ;;  %v283_v8 = vld [vmem:[%s272_s8 + $0x28] sm:$0xff]  ;;  %v285_v9 = vld [vmem:[%s272_s8 + $0x38] sm:$0xff]  ;;  %v620_v3 = vlaneseq }
  0x13   : > { %v1002_v10 = vpack.c.bf16 %v280_v7, %v278_v5  ;;  %v1004_v11 = vpack.c.bf16 %v285_v9, %v283_v8  ;;  %v282_v12 = vld [vmem:[%s272_s8 + $0x20] sm:$0xff]  ;;  %v284_v13 = vld [vmem:[%s272_s8 + $0x30] sm:$0xff]  ;;  %v287_v15 = vld [vmem:[%s272_s8 + $0x48] sm:$0xf] }
  0x14   : > { %1001 = vmatprep.subr.bf16.mxu0 %v1000_v6  ;;  %v1006_v14 = vpack.c.bf16 %v284_v13, %v282_v12  ;;  %v286_v16 = vld [vmem:[%s272_s8 + $0x40] sm:$0xf]  ;;  %v621_v5 = vshrl.u32 %v620_v3, 7 }
  0x15   : > { %1003 = vmatpush1.bf16.msra.mxu0 %v1002_v10 }
  0x16   : > { %1005 = vmatprep.subr.bf16.mxu0 %v1004_v11  ;;  %v622_v7 = vsub.s32 0, %v621_v5 }
  0x19   : > { %1007 = vmatpush1.bf16.msra.mxu0 %v1006_v14 }
  0x1a   : > { %907 = vmatprep.subr.msk.mxu0 %vm298_vm0, %v287_v15 }
  0x1d   : > { %908 = vmatpush1.msk.msra.mxu0 %vm298_vm0, %v286_v16 }
  0x1e   : > { %909 = vmatmul.mubr.msk.f32.vlgmr.msra.gmra.mrb[0].mxu0 %vm294_vm1, %v277_v17 }
  0x86   : > { %v292_v18 = vpop.permute.xlu0 %291 }
  0xf1   : > { %v371_v19 = vpop.f32.mrb[0].mxu0 }
  0xf2   : > { %v372_v20 = vadd.f32 %v371_v19, %v292_v18  ;;  %v373_v21 = vpop.f32.mrb[1].mxu0 }
  0xf3   : > { %v374_v22 = vadd.f32 %v373_v21, %v292_v18 }
  0xf4   : > { %v376_v23 = vmax.f32 %v372_v20, 0.0 }
  0xf5   : > { %v377_v24 = vmax.f32 %v374_v22, 0.0 }
  0xf7   : > { %v378_v25 = vadd.f32 %v377_v24, %v376_v23 }
  0xf9   : > { %379 = vadd.xlane.f32.xlu0 %v378_v25 }
 0x186   : > { %v380_v27 = vpop.xlane.xlu0 %379 }
 0x187   : > { %v381_v28 = vmul.f32 0.00390625, %v380_v27 }
 0x189   : > { %955 = vmatprep.subr.mxu1 %v381_v28 }
 0x18a   : > { %956 = vmatpush3.msra.mxu1 %v381_v28 }
 0x18b   : > { %958 = vmatmul.mubr.msk.f32.vlgmr.msra.gmra.mrb[0].mxu1 %vm406_vm2, %v383_v29 }
 0x18c   : > { %960 = vmatprep.mubr.msk.f32.mxu1 %vm406_vm2, %v384_v30 }
 0x18f   : > { %961 = vmatmul.mubr.msk.f32.gmra.mrb[2].mxu1 %vm406_vm2, %v385_v31 }
 0x190   : > { %963 = vmatprep.mubr.msk.f32.mxu1 %vm406_vm2, %v386_v32 }
 0x193   : > { %964 = vmatmul.mubr.msk.f32.gmra.mrb[4].mxu1 %vm406_vm2, %v387_v33 }
 0x194   : > { %966 = vmatprep.mubr.msk.f32.mxu1 %vm406_vm2, %v388_v34 }
 0x197   : > { %967 = vmatmul.mubr.msk.f32.gmra.mrb[6].mxu1 %vm406_vm2, %v389_v35 }
 0x198   : > { %969 = vmatprep.mubr.msk.f32.mxu1 %vm406_vm2, %v390_v60 }
 0x19b   : > { %970 = vmatmul.mubr.msk.f32.gmra.mrb[8].mxu1 %vm406_vm2, %v391_v61 }
 0x19c   : > { %972 = vmatprep.mubr.msk.f32.mxu1 %vm406_vm2, %v392_v62 }
 0x19f   : > { %973 = vmatmul.mubr.msk.f32.gmra.mrb[10].mxu1 %vm406_vm2, %v393_v63 }
 0x25e   : > { %v959_v37 = vpop.f32.mrb[0].mxu1 }
 0x25f   : > { %v515_v38 = vadd.f32 %v959_v37, %v395_v36  ;;  %v509_v39 = vpop.f32.mrb[1].mxu1 }
 0x260   : > { %v510_v43 = vadd.f32 %v509_v39, %v394_v40  ;;  %v403_v39 = vld [vmem:[%s1241_s4 + $0x48] sm:$0xff] }
 0x261   : > { %607 = vperm.xlu1 %1036, %v515_v38  }
 0x262   : > { %v962_v42 = vpop.f32.mrb[2].mxu1 }
 0x263   : > { %v519_v44 = vpop.f32.mrb[3].mxu1  ;;  %v525_v45 = vadd.f32 %v962_v42, %v397_v41  ;;  %v402_v41 = vld [vmem:[%s1241_s4 + $0x40] sm:$0xff] }
 0x264   : > { %v520_v50 = vadd.f32 %v519_v44, %v396_v48  ;;  %v404_v48 = vld [vmem:[%s1241_s4 + $0x50] sm:$0xff] }
 0x265   : > { %602 = vperm.xlu1 %1036, %v510_v43  }
 0x266   : > { %v965_v46 = vpop.f32.mrb[4].mxu1 }
 0x267   : > { %v529_v47 = vpop.f32.mrb[5].mxu1  ;;  %v535_v56 = vadd.f32 %v965_v46, %v399_v54  ;;  %v405_v46 = vld [vmem:[%s1241_s4 + $0x58] sm:$0xff] }
 0x268   : > { %v530_v53 = vadd.f32 %v529_v47, %v398_v52 }
 0x269   : > { %617 = vperm.xlu1 %1036, %v525_v45  }
 0x26a   : > { %v968_v49 = vpop.f32.mrb[6].mxu1 }
 0x26b   : > { %v539_v51 = vpop.f32.mrb[7].mxu1  ;;  %v545_v59 = vadd.f32 %v968_v49, %v401_v58 }
 0x26c   : > { %v540_v57 = vadd.f32 %v539_v51, %v400_v55 }
 0x26d   : > { %612 = vperm.xlu1 %1036, %v520_v50  }
 0x26e   : > { %v971_v38 = vpop.f32.mrb[8].mxu1 }
 0x26f   : > { %v549_v40 = vpop.f32.mrb[9].mxu1  ;;  %v555_v42 = vadd.f32 %v971_v38, %v403_v39 }
 0x270   : > { %v550_v43 = vadd.f32 %v549_v40, %v402_v41 }
 0x272   : > { %v1008_v44 = vpack.c.bf16 %v555_v42, %v550_v43  ;;  %v974_v45 = vpop.f32.mrb[10].mxu1 }
 0x273   : > { %v559_v47 = vpop.f32.mrb[11].mxu1  ;;  %v565_v49 = vadd.f32 %v974_v45, %v405_v46 }
 0x274   : > { %v560_v50 = vadd.f32 %v559_v47, %v404_v48  ;;  %1009 = vmatprep.subr.bf16.mxu0 %v1008_v44 }
 0x275   : > { %1011 = vmatpush3.bf16.msra.mxu0 %v1008_v44 }
 0x276   : > { %v1012_v51 = vpack.c.bf16 %v565_v49, %v560_v50 }
 0x278   : > { %1013 = vmatprep.subr.bf16.mxu0 %v1012_v51 }
 0x279   : > { %1015 = vmatpush3.bf16.msra.mxu0 %v1012_v51 }
 0x296   : > { %568 = vxpose.xlu1.b32.start [1/4] (short) (narrow) %v530_v53, 8 }
 0x29a   : > { %569 = vxpose.xlu1.b32.cont [2/4] (short) (narrow) %v535_v56, 8 }
 0x29e   : > { %570 = vxpose.xlu1.b32.cont [3/4] (short) (narrow) %v540_v57, 8 }
 0x2a2   : > { %571 = vxpose.xlu1.b32.end [4/4] (short) (narrow) %v545_v59, 8 }
 0x2e0   : > { %v608_v1 = vpop.permute.xlu1 %607 }
 0x2e4   : > { %v603_v2 = vpop.permute.xlu1 %602 }
 0x2e8   : > { %v618_v4 = vpop.permute.xlu1 %617 }
 0x2ec   : > { %v613_v6 = vpop.permute.xlu1 %612 }
 0x316   : > { %v584_v8 = vpop.trf.xlu1 }
 0x317   : > { %v623_v9 = vrot.slane %v584_v8, %v622_v7  ;;  %v770_v8 = vld [vmem:[%s1242_s5] sm:$0x3] }
 0x319   : > { %v625_v10 = vmul.f32 %v623_v9, %v608_v1  ;;  %v624_v12 = vmul.f32 %v623_v9, %v603_v2  ;;  %v626_v14 = vmul.f32 %v623_v9, %v613_v6  ;;  %v627_v16 = vmul.f32 %v623_v9, %v618_v4 }
 0x31a   : > { %v1063_v1 = vmov 0.0|0.0  }
 0x31b   : > { %v632_v11 = vsel %vm628_vm3, %v625_v10, -inf  ;;  %v629_v13 = vsel %vm628_vm3, %v624_v12, -inf  ;;  %v635_v15 = vsel %vm628_vm3, %v626_v14, -inf  ;;  %v638_v17 = vsel %vm628_vm3, %v627_v16, -inf  ;;  %1016 = vmatprep.subr.bf16.mxu0 %v1063_v1 }
 0x31c   : > { %633 = vmax.xlane.f32.xlu0 %v632_v11 }
 0x320   : > { %630 = vmax.xlane.f32.xlu0 %v629_v13 }
 0x324   : > { %636 = vmax.xlane.f32.xlu0 %v635_v15 }
 0x328   : > { %639 = vmax.xlane.f32.xlu0 %v638_v17 }
 0x3a9   : > { %v634_v18 = vpop.xlane.xlu0 %633 }
 0x3aa   : > { %v642_v19 = vsub.f32 %v625_v10, %v634_v18 }
 0x3ac   : > { %v647_v20 = vmul.f32 1.442695, %v642_v19 }
 0x3ad   : > { %v631_v21 = vpop.xlane.xlu0 %630 }
 0x3ae   : > { %1037 = vpow2.f32 %v647_v20  ;;  %v641_v22 = vsub.f32 %v624_v12, %v631_v21 }
 0x3b0   : > { %v645_v23 = vmul.f32 1.442695, %v641_v22 }
 0x3b1   : > { %v637_v24 = vpop.xlane.xlu0 %636 }
 0x3b2   : > { %1039 = vpow2.f32 %v645_v23  ;;  %v643_v25 = vsub.f32 %v626_v14, %v637_v24 }
 0x3b4   : > { %v649_v26 = vmul.f32 1.442695, %v643_v25 }
 0x3b5   : > { %v640_v27 = vpop.xlane.xlu0 %639 }
 0x3b6   : > { %1041 = vpow2.f32 %v649_v26  ;;  %v644_v28 = vsub.f32 %v627_v16, %v640_v27 }
 0x3b8   : > { %v1038_v29 = vpop.eup %1037  ;;  %v651_v30 = vmul.f32 1.442695, %v644_v28 }
 0x3b9   : > { %v656_v31 = vsel %vm628_vm3, %v1038_v29, 0.0 }
 0x3ba   : > { %1043 = vpow2.f32 %v651_v30  ;;  %657 = vadd.xlane.f32.xlu0 %v656_v31 }
 0x3bc   : > { %v1040_v32 = vpop.eup %1039 }
 0x3bd   : > { %v653_v33 = vsel %vm628_vm3, %v1040_v32, 0.0 }
 0x3be   : > { %654 = vadd.xlane.f32.xlu0 %v653_v33 }
 0x3c0   : > { %v1042_v34 = vpop.eup %1041 }
 0x3c1   : > { %v659_v35 = vsel %vm628_vm3, %v1042_v34, 0.0 }
 0x3c2   : > { %660 = vadd.xlane.f32.xlu0 %v659_v35 }
 0x3c4   : > { %v1044_v36 = vpop.eup %1043 }
 0x3c5   : > { %v662_v37 = vsel %vm628_vm3, %v1044_v36, 0.0 }
 0x3c6   : > { %663 = vadd.xlane.f32.xlu0 %v662_v37 }
 0x447   : > { %v658_v52 = vpop.xlane.xlu0 %657 }
 0x448   : > { %1045 = vrcp.f32 %v658_v52 }
 0x44b   : > { %v655_v53 = vpop.xlane.xlu0 %654 }
 0x44c   : > { %1047 = vrcp.f32 %v655_v53 }
 0x44f   : > { %v661_v54 = vpop.xlane.xlu0 %660 }
 0x450   : > { %1049 = vrcp.f32 %v661_v54 }
 0x452   : > { %v1046_v56 = vpop.eup %1045 }
 0x453   : > { %v664_v55 = vpop.xlane.xlu0 %663  ;;  %v670_v59 = vmul.f32 %v1046_v56, %v1038_v29 }
 0x454   : > { %1051 = vrcp.f32 %v664_v55 }
 0x456   : > { %v1048_v57 = vpop.eup %1047 }
 0x457   : > { %v669_v58 = vmul.f32 %v1048_v57, %v1040_v32 }
 0x459   : > { %983 = vmatprep.mubr.msk.f32.mxu0 %vm628_vm3, %v669_v58 }
 0x45a   : > { %v1050_v60 = vpop.eup %1049  ;;  %984 = vmatmul.mubr.msk.f32.vlgmr.msra.gmra.mrb[2].mxu0 %vm628_vm3, %v670_v59 }
 0x45b   : > { %v671_v61 = vmul.f32 %v1050_v60, %v1042_v34 }
 0x45d   : > { %986 = vmatprep.mubr.msk.f32.mxu0 %vm628_vm3, %v671_v61 }
 0x45e   : > { %v1052_v62 = vpop.eup %1051 }
 0x45f   : > { %v672_v63 = vmul.f32 %v1052_v62, %v1044_v36 }
 0x461   : > { %987 = vmatmul.mubr.msk.f32.gmra.mrb[4].mxu0 %vm628_vm3, %v672_v63 }
 0x462   : > { %997 = vmatprep.mubr.msk.f32.mxu0 %vm1064_vm4, %v1061_v0  ;;  %v771_v0 = vld [vmem:[%s1243_s6] sm:$0x3] }
 0x52d   : > { %v985_v2 = vpop.f32.mrb[2].mxu0 }
 0x52e   : > { %v751_v3 = vpop.f32.mrb[3].mxu0 }
 0x52f   : > { %v1017_v4 = vpack.c.bf16 %v985_v2, %v751_v3 }
 0x531   : > { %1018 = vmatpush3.bf16.msra.mxu0 %v1017_v4 }
 0x532   : > { %1019 = vmatprep.subr.bf16.mxu0 %v1063_v1 }
 0x534   : > { %v988_v5 = vpop.f32.mrb[4].mxu0 }
 0x535   : > { %v761_v6 = vpop.f32.mrb[5].mxu0 }
 0x536   : > { %v1020_v7 = vpack.c.bf16 %v988_v5, %v761_v6 }
 0x538   : > { %1021 = vmatpush3.bf16.msra.mxu0 %v1020_v7 }
 0x53b   : > { %998 = vmatmul.mubr.msk.f32.vlgmr.msra.gmra.mrb[6].mxu0 %vm628_vm3, %v770_v8 }
 0x60e   : > { %v841_v9 = vpop.f32.mrb[6].mxu0 }
 0x60f   : > { %v842_v10 = vadd.f32 %v841_v9, %v771_v0  ;;  %v999_v11 = vpop.f32.mrb[7].mxu0 }
 0x611   : > { %846 = vst.msk [vmem:[%s276_s26] sm:$0x3] %vm845_vm5, %v842_v10 }
 0x612 PF: > { %s17_s24 = sadd.s32 1, %s1059_s24  }
 0x613   : > { %p14_p4 = scmp.ge.s32.totalorder %s17_s24, 4  }
 0x615   :  { %16 = sbr.rel (!%p14_p4) target bundleno = 1 (0x1), region = 78 }

</bundles_post_ra>
